<compile_context>
chip_gen: v7x
topology: tpu7x:2x2x1
jax: 0.10.0
libtpu: 0.0.40
codegen_flags: <defaults>
</compile_context>

<pallas_src>
import functools

import jax
import jax.numpy as jnp
from jax.experimental import pallas as pl
from jax.experimental.pallas import tpu as pltpu


def _round_up(n, m):
    return ((n + m - 1) // m) * m


def _squeezed():
    # pl.Squeezed() where available; `None` is the long-standing equivalent.
    return pl.Squeezed() if hasattr(pl, "Squeezed") else None


def _vmem_limit_bytes():
    """Physical VMEM minus ~8 MiB compiler-scratch headroom.

    ~120 MiB on v5e/v6e (128 MiB physical), ~56 MiB on v7x (64 MiB physical).
    Falls back to 64 MiB if the hardware query is unavailable.
    """
    try:
        cap = int(pltpu.get_tpu_info().vmem_capacity_bytes)
    except Exception:
        cap = 0
    if cap < 32 * 1024 * 1024:
        return 64 * 1024 * 1024
    return cap - 8 * 1024 * 1024


# ------------------------------ Pallas kernel ------------------------------- #

def _moe_experts_kernel(act_ref, cnt_ref,           # SMEM (scalar prefetch, both 1-D)
                        x_ref,                       # [tm, H]    compute dtype (bf16/f32)
                        cw_ref,                      # [tm, 1]    f32 combine weights (active expert j)
                        w13_ref, w2_ref,             # [H, 2I], [I, H]  routed expert (compacted index)
                        sw13_ref, sw2_ref,           # [H, 2Is], [Is, H] shared expert
                        o_ref,                       # [tm, H]    x.dtype output (written at last j)
                        acc_ref):                    # [tm, H]    f32 accumulator scratch
    t = pl.program_id(0)
    j = pl.program_id(1)

    @pl.when(j == 0)
    def _():
        # Initialise the accumulator with the fused shared-expert SwiGLU output.
        x = x_ref[...]
        i_sh = sw13_ref.shape[-1] // 2
        hu = jnp.dot(x, sw13_ref[...], preferred_element_type=jnp.float32)
        h, u = hu[:, :i_sh], hu[:, i_sh:]
        g = h * jax.nn.sigmoid(h)                                   # SiLU in f32 (v5e VPU has no bf16)
        acc_ref[...] = jnp.dot((g * u).astype(x.dtype), sw2_ref[...],
                               preferred_element_type=jnp.float32)

    @pl.when(j < cnt_ref[t])
    def _():
        # j-th *active* routed expert of this token tile (compacted dispatch).
        x = x_ref[...]
        i_r = w13_ref.shape[-1] // 2
        hu = jnp.dot(x, w13_ref[...], preferred_element_type=jnp.float32)   # gate+up fused
        h, u = hu[:, :i_r], hu[:, i_r:]
        g = h * jax.nn.sigmoid(h)
        # combine weight applied on the [tm, I] tensor, BEFORE the down-projection
        p = (cw_ref[...] * (g * u)).astype(x.dtype)
        acc_ref[...] += jnp.dot(p, w2_ref[...], preferred_element_type=jnp.float32)

    @pl.when(j == pl.num_programs(1) - 1)
    def _():
        o_ref[...] = acc_ref[...].astype(o_ref.dtype)


# -------------------------------- Wrapper ------------------------------------ #

def prepare_moe_params(raw, compute_dtype=jnp.bfloat16):
    """One-time weight preparation (do NOT call per forward):
       * fuse gate_proj / up_proj into a single [.., H, 2I] matmul operand,
       * cast expert weights to the MXU compute dtype (bf16) exactly once,
       * keep the tiny gating weight in f32 (gate runs in f32 outside the kernel)."""
    return {
        "w_gate": raw["w_gate"].astype(jnp.float32),                               # [E, H]
        "w13": jnp.concatenate([raw["w1"], raw["w3"]], axis=-1).astype(compute_dtype),   # [E, H, 2I]
        "w2": raw["w2"].astype(compute_dtype),                                     # [E, I, H]
        "sw13": jnp.concatenate([raw["sw1"], raw["sw3"]], axis=-1).astype(compute_dtype),  # [H, 2Is]
        "sw2": raw["sw2"].astype(compute_dtype),                                   # [Is, H]
    }


def moe_forward(x, params, *, top_k, norm_topk_prob=True, tm=512):
    """x: [B, S, H]; params from prepare_moe_params. Returns (y [B,S,H] in x.dtype, None)."""
    B, S, H = x.shape
    E = params["w13"].shape[0]
    compute_dtype = params["w13"].dtype

    xf = x.reshape(-1, H)
    T = xf.shape[0]

    # ---- gating: softmax(x @ Wg^T), top-k, dense combine-weight scatter (tiny; XLA) ----
    logits = jnp.dot(xf.astype(jnp.float32), params["w_gate"].T)
    scores = jax.nn.softmax(logits, axis=-1)                         # [T, E] f32
    topk_w, topk_idx = jax.lax.top_k(scores, top_k)                  # [T, K]
    if top_k > 1 and norm_topk_prob:
        topk_w = topk_w / (jnp.sum(topk_w, axis=-1, keepdims=True) + 1e-20)
    onehot = jax.nn.one_hot(topk_idx, E, dtype=jnp.float32)          # [T, K, E]
    combine_w = jnp.sum(onehot * topk_w[..., None], axis=1)          # [T, E] f32

    # ---- token tiling (16-row granularity keeps bf16 windows tile-aligned) ----
    tm_eff = min(tm, _round_up(T, 16))
    if T > 16 and _round_up(T, tm_eff) // tm_eff < 2:
        # prefer >= 2 token tiles so both TensorCores of dual-core chips get real work
        tm_eff = _round_up((T + 1) // 2, 16)
    T_pad = _round_up(T, tm_eff)
    nt = T_pad // tm_eff
    pad = T_pad - T
    if pad:
        xf = jnp.pad(xf, ((0, pad), (0, 0)))
        combine_w = jnp.pad(combine_w, ((0, pad), (0, 0)))

    # ---- per-tile compacted active-expert table + counts (1-D SMEM scalar prefetch) ----
    # index_maps read act[t*E + j]; past the count the last entry repeats, so the block
    # index does not change and no new weight DMA is issued for inactive experts.
    cw_tiles = combine_w.reshape(nt, tm_eff, E)
    mask = (cw_tiles > 0.0).any(axis=1)                               # [nt, E]
    count = mask.sum(axis=1).astype(jnp.int32)                        # [nt]
    maski = mask.astype(jnp.int32)
    order_key = (1 - maski) * E + jnp.arange(E, dtype=jnp.int32)[None, :]
    perm = jnp.argsort(order_key, axis=1).astype(jnp.int32)           # active experts first
    j_idx = jnp.arange(E, dtype=jnp.int32)[None, :]
    last = jnp.maximum(count - 1, 0)[:, None]
    sel = jnp.where(j_idx < count[:, None], j_idx, last)
    active = jnp.take_along_axis(perm, sel, axis=1).reshape(-1).astype(jnp.int32)  # [nt*E]

    # combine weights as [E, T_pad, 1]: each grid step DMAs only its own expert's column
    cw_t = combine_w.T[:, :, None]
    x_in = xf.astype(compute_dtype)        # activations only; weights are NOT cast per call

    two_i = params["w13"].shape[-1]
    i_r = params["w2"].shape[1]
    two_is = params["sw13"].shape[-1]
    i_s = params["sw2"].shape[0]

    sq = _squeezed()
    # shared weights: constant index_map -> single-buffer (no dead double-buffer VMEM)
    single = ({"pipeline_mode": pl.Buffered(buffer_count=1)}
              if hasattr(pl, "Buffered") else {})

    y_flat = pl.pallas_call(
        _moe_experts_kernel,
        out_shape=jax.ShapeDtypeStruct((T_pad, H), x.dtype),
        grid_spec=pltpu.PrefetchScalarGridSpec(
            num_scalar_prefetch=2,
            grid=(nt, E),                                   # experts (reduction) last
            in_specs=[
                pl.BlockSpec((tm_eff, H), lambda t, j, act, cnt: (t, 0)),          # x tile
                pl.BlockSpec((sq, tm_eff, 1),
                             lambda t, j, act, cnt: (act[t * E + j], t, 0)),       # cw column
                pl.BlockSpec((sq, H, two_i),
                             lambda t, j, act, cnt: (act[t * E + j], 0, 0)),       # w13[e]
                pl.BlockSpec((sq, i_r, H),
                             lambda t, j, act, cnt: (act[t * E + j], 0, 0)),       # w2[e]
                pl.BlockSpec((H, two_is), lambda t, j, act, cnt: (0, 0), **single),  # shared w13
                pl.BlockSpec((i_s, H), lambda t, j, act, cnt: (0, 0), **single),     # shared w2
            ],
            out_specs=pl.BlockSpec((tm_eff, H), lambda t, j, act, cnt: (t, 0)),
            scratch_shapes=[pltpu.VMEM((tm_eff, H), jnp.float32)],   # f32 accumulator
        ),
        compiler_params=pltpu.CompilerParams(
            dimension_semantics=("parallel", "arbitrary"),
            vmem_limit_bytes=_vmem_limit_bytes(),
        ),
    )(active, count, x_in, cw_t, params["w13"], params["w2"],
      params["sw13"], params["sw2"])

    y = y_flat[:T].reshape(B, S, H)
    return y, None    # aux_loss is None in eval mode


# --------------------------- pure-JAX reference ------------------------------ #

def moe_reference(x, raw, *, top_k, norm_topk_prob=True, compute_dtype=jnp.float32):
    B, S, H = x.shape
    E = raw["w1"].shape[0]
    xf = x.reshape(-1, H).astype(jnp.float32)
    scores = jax.nn.softmax(xf @ raw["w_gate"].astype(jnp.float32).T, axis=-1)
    topk_w, topk_idx = jax.lax.top_k(scores, top_k)
    if top_k > 1 and norm_topk_prob:
        topk_w = topk_w / (jnp.sum(topk_w, axis=-1, keepdims=True) + 1e-20)
    cw = jnp.sum(jax.nn.one_hot(topk_idx, E, dtype=jnp.float32)
                 * topk_w[..., None], axis=1)

    cd = compute_dtype
    xc = xf.astype(cd)

    def mlp(xx, w1, w3, w2):
        h = jnp.dot(xx, w1.astype(cd), preferred_element_type=jnp.float32)
        u = jnp.dot(xx, w3.astype(cd), preferred_element_type=jnp.float32)
        g = h * jax.nn.sigmoid(h)
        return jnp.dot((g * u).astype(cd), w2.astype(cd),
                       preferred_element_type=jnp.float32)

    y = jnp.zeros((xf.shape[0], H), jnp.float32)
    for e in range(E):
        y = y + cw[:, e:e + 1] * mlp(xc, raw["w1"][e], raw["w3"][e], raw["w2"][e])
    y = y + mlp(xc, raw["sw1"], raw["sw3"], raw["sw2"])
    return y.astype(x.dtype).reshape(B, S, H)


# ---------------------------------- main -------------------------------------- #

if __name__ == "__main__":
    # Small config consistent with the module's __init__.
    B, S, H = 2, 13, 32         # T = 26 -> two 16-token tiles + 6 padded rows
    E = 8                       # n_routed_experts
    K = 2                       # num_experts_per_tok
    I = 64                      # moe_intermediate_size (2I = 128 lanes)
    N_SHARED = 1                # n_shared_experts
    I_SHARED = I * N_SHARED

    key = jax.random.PRNGKey(0)
    ks = jax.random.split(key, 8)
    scale = 0.05
    raw = {
        "w_gate": jax.random.normal(ks[0], (E, H), jnp.float32) * scale,
        "w1": jax.random.normal(ks[1], (E, H, I), jnp.float32) * scale,   # gate_proj
        "w3": jax.random.normal(ks[2], (E, H, I), jnp.float32) * scale,   # up_proj
        "w2": jax.random.normal(ks[3], (E, I, H), jnp.float32) * scale,   # down_proj
        "sw1": jax.random.normal(ks[4], (H, I_SHARED), jnp.float32) * scale,
        "sw3": jax.random.normal(ks[5], (H, I_SHARED), jnp.float32) * scale,
        "sw2": jax.random.normal(ks[6], (I_SHARED, H), jnp.float32) * scale,
    }
    x = jax.random.normal(ks[7], (B, S, H), jnp.float32)

    fwd = jax.jit(functools.partial(moe_forward, top_k=K, norm_topk_prob=True))

    # 1) f32 weights: tight structural check vs the pure-JAX reference.
    params_f32 = prepare_moe_params(raw, jnp.float32)
    y32, aux = fwd(x, params_f32)
    y32 = jax.block_until_ready(y32)
    ref32 = moe_reference(x, raw, top_k=K, norm_topk_prob=True,
                          compute_dtype=jnp.float32)
    assert y32.shape == (B, S, H) and y32.dtype == x.dtype
    assert aux is None
    assert jnp.allclose(y32, ref32, atol=1e-4, rtol=1e-4), "f32 mismatch vs reference"

    # 2) Production config: weights prepared ONCE in bf16 (no per-call weight cast).
    params_bf16 = prepare_moe_params(raw, jnp.bfloat16)
    y16, aux16 = fwd(x, params_bf16)
    y16 = jax.block_until_ready(y16)
    ref16 = moe_reference(x, raw, top_k=K, norm_topk_prob=True,
                          compute_dtype=jnp.bfloat16)
    assert aux16 is None
    assert jnp.allclose(y16, ref16, atol=5e-3, rtol=5e-2), "bf16 mismatch vs matched ref"
    assert jnp.allclose(y16, ref32, atol=2e-2, rtol=2e-2), "bf16 drifted from f32 ref"

    # 3) bf16 activations too (exercises the bf16 output-writeback path).
    xb = x.astype(jnp.bfloat16)
    yb, _ = fwd(xb, params_bf16)
    yb = jax.block_until_ready(yb)
    refb = moe_reference(xb, raw, top_k=K, norm_topk_prob=True,
                         compute_dtype=jnp.bfloat16)
    assert yb.dtype == jnp.bfloat16
    assert jnp.allclose(yb.astype(jnp.float32), refb.astype(jnp.float32),
                        atol=5e-3, rtol=5e-2), "bf16-activation mismatch vs matched ref"

    print("KERNEL_OK")
</pallas_src>

<mosaic_0001>
module attributes {stable_mosaic.version = 11 : i64} {
  func.func @_moe_experts_kernel(%arg0: i32, %arg1: i32, %arg2: memref<16xi32, #tpu.memory_space<smem>>, %arg3: memref<2xi32, #tpu.memory_space<smem>>, %arg4: memref<16x32xf32, #tpu.memory_space<vmem>>, %arg5: memref<1x16x1xf32, #tpu.memory_space<vmem>>, %arg6: memref<1x32x128xf32, #tpu.memory_space<vmem>>, %arg7: memref<1x64x32xf32, #tpu.memory_space<vmem>>, %arg8: memref<32x128xf32, #tpu.memory_space<vmem>>, %arg9: memref<64x32xf32, #tpu.memory_space<vmem>>, %arg10: memref<16x32xf32, #tpu.memory_space<vmem>>, %arg11: memref<16x32xf32, #tpu.memory_space<vmem>>) attributes {dimension_semantics = [#tpu.dimension_semantics<parallel>, #tpu.dimension_semantics<arbitrary>], iteration_bounds = array<i64: 2, 8>, scalar_prefetch = 2 : i64, scratch_operands = 1 : i64, tpu.core_type = #tpu.core_type<tc>, window_params = [{transform_indices = @transform_0, window_bounds = array<i64: 16, 32>}, {transform_indices = @transform_1, window_bounds = array<i64: 1, 16, 1>}, {transform_indices = @transform_2, window_bounds = array<i64: 1, 32, 128>}, {transform_indices = @transform_3, window_bounds = array<i64: 1, 64, 32>}, {pipeline_mode = #tpu.pipeline_mode<synchronous>, transform_indices = @transform_4, window_bounds = array<i64: 32, 128>}, {pipeline_mode = #tpu.pipeline_mode<synchronous>, transform_indices = @transform_5, window_bounds = array<i64: 64, 32>}, {transform_indices = @transform_6, window_bounds = array<i64: 16, 32>}]} {
    %c0_i32 = arith.constant 0 : i32
    %0 = arith.cmpi eq, %arg1, %c0_i32 : i32
    %1 = arith.extui %0 : i1 to i32
    %c0_i32_0 = arith.constant 0 : i32
    %2 = arith.cmpi ne, %1, %c0_i32_0 : i32
    scf.if %2 {
      %c0 = arith.constant 0 : index
      %c0_3 = arith.constant 0 : index
      %11 = vector.load %arg4[%c0, %c0_3] : memref<16x32xf32, #tpu.memory_space<vmem>>, vector<16x32xf32>
      %c0_4 = arith.constant 0 : index
      %c0_5 = arith.constant 0 : index
      %12 = vector.load %arg8[%c0_4, %c0_5] : memref<32x128xf32, #tpu.memory_space<vmem>>, vector<32x128xf32>
      %cst = arith.constant dense<0.000000e+00> : vector<16x128xf32>
      %13 = tpu.matmul %11, %12, %cst {dimension_numbers = #tpu.dot_dimension_numbers<[1], [0], [0], [1], [0, 0, 1, 1], [], []>} : vector<16x32xf32>, vector<32x128xf32>, vector<16x128xf32> -> vector<16x128xf32>
      %14 = vector.extract_strided_slice %13 {offsets = [0, 0], sizes = [16, 64], strides = [1, 1]} : vector<16x128xf32> to vector<16x64xf32>
      %15 = vector.extract_strided_slice %13 {offsets = [0, 64], sizes = [16, 64], strides = [1, 1]} : vector<16x128xf32> to vector<16x64xf32>
      %16 = arith.negf %14 : vector<16x64xf32>
      %17 = math.exp %16 : vector<16x64xf32>
      %cst_6 = arith.constant 1.000000e+00 : f32
      %18 = vector.broadcast %cst_6 : f32 to vector<16x64xf32>
      %19 = arith.addf %18, %17 : vector<16x64xf32>
      %20 = arith.divf %18, %19 : vector<16x64xf32>
      %21 = arith.mulf %14, %20 : vector<16x64xf32>
      %22 = arith.mulf %21, %15 : vector<16x64xf32>
      %c0_7 = arith.constant 0 : index
      %c0_8 = arith.constant 0 : index
      %23 = vector.load %arg9[%c0_7, %c0_8] : memref<64x32xf32, #tpu.memory_space<vmem>>, vector<64x32xf32>
      %cst_9 = arith.constant dense<0.000000e+00> : vector<16x32xf32>
      %24 = tpu.matmul %22, %23, %cst_9 {dimension_numbers = #tpu.dot_dimension_numbers<[1], [0], [0], [1], [0, 0, 1, 1], [], []>} : vector<16x64xf32>, vector<64x32xf32>, vector<16x32xf32> -> vector<16x32xf32>
      %c0_10 = arith.constant 0 : index
      %c0_11 = arith.constant 0 : index
      %25 = vector.load %arg11[%c0_10, %c0_11] : memref<16x32xf32, #tpu.memory_space<vmem>>, vector<16x32xf32>
      tpu.vector_store %arg11[%c0_10, %c0_11], %24 {strides = array<i32>} : memref<16x32xf32, #tpu.memory_space<vmem>>, vector<16x32xf32>,
    } else {
    }
    %3 = arith.index_cast %arg0 : i32 to index
    %4 = memref.load %arg3[%3] : memref<2xi32, #tpu.memory_space<smem>>
    %5 = arith.cmpi slt, %arg1, %4 : i32
    %6 = arith.extui %5 : i1 to i32
    %c0_i32_1 = arith.constant 0 : i32
    %7 = arith.cmpi ne, %6, %c0_i32_1 : i32
    scf.if %7 {
      %c0 = arith.constant 0 : index
      %c0_3 = arith.constant 0 : index
      %11 = vector.load %arg4[%c0, %c0_3] : memref<16x32xf32, #tpu.memory_space<vmem>>, vector<16x32xf32>
      %c0_4 = arith.constant 0 : index
      %c0_5 = arith.constant 0 : index
      %c0_6 = arith.constant 0 : index
      %12 = vector.load %arg6[%c0_4, %c0_5, %c0_6] : memref<1x32x128xf32, #tpu.memory_space<vmem>>, vector<1x32x128xf32>
      %13 = vector.shape_cast %12 : vector<1x32x128xf32> to vector<32x128xf32>
      %cst = arith.constant dense<0.000000e+00> : vector<16x128xf32>
      %14 = tpu.matmul %11, %13, %cst {dimension_numbers = #tpu.dot_dimension_numbers<[1], [0], [0], [1], [0, 0, 1, 1], [], []>} : vector<16x32xf32>, vector<32x128xf32>, vector<16x128xf32> -> vector<16x128xf32>
      %15 = vector.extract_strided_slice %14 {offsets = [0, 0], sizes = [16, 64], strides = [1, 1]} : vector<16x128xf32> to vector<16x64xf32>
      %16 = vector.extract_strided_slice %14 {offsets = [0, 64], sizes = [16, 64], strides = [1, 1]} : vector<16x128xf32> to vector<16x64xf32>
      %17 = arith.negf %15 : vector<16x64xf32>
      %18 = math.exp %17 : vector<16x64xf32>
      %cst_7 = arith.constant 1.000000e+00 : f32
      %19 = vector.broadcast %cst_7 : f32 to vector<16x64xf32>
      %20 = arith.addf %19, %18 : vector<16x64xf32>
      %21 = arith.divf %19, %20 : vector<16x64xf32>
      %22 = arith.mulf %15, %21 : vector<16x64xf32>
      %c0_8 = arith.constant 0 : index
      %c0_9 = arith.constant 0 : index
      %c0_10 = arith.constant 0 : index
      %23 = vector.load %arg5[%c0_8, %c0_9, %c0_10] : memref<1x16x1xf32, #tpu.memory_space<vmem>>, vector<1x16x1xf32>
      %24 = vector.shape_cast %23 : vector<1x16x1xf32> to vector<16x1xf32>
      %25 = arith.mulf %22, %16 : vector<16x64xf32>
      %26 = vector.broadcast %24 : vector<16x1xf32> to vector<16x64xf32>
      %27 = arith.mulf %26, %25 : vector<16x64xf32>
      %c0_11 = arith.constant 0 : index
      %c0_12 = arith.constant 0 : index
      %28 = vector.load %arg11[%c0_11, %c0_12] : memref<16x32xf32, #tpu.memory_space<vmem>>, vector<16x32xf32>
      %c0_13 = arith.constant 0 : index
      %c0_14 = arith.constant 0 : index
      %c0_15 = arith.constant 0 : index
      %29 = vector.load %arg7[%c0_13, %c0_14, %c0_15] : memref<1x64x32xf32, #tpu.memory_space<vmem>>, vector<1x64x32xf32>
      %30 = vector.shape_cast %29 : vector<1x64x32xf32> to vector<64x32xf32>
      %cst_16 = arith.constant dense<0.000000e+00> : vector<16x32xf32>
      %31 = tpu.matmul %27, %30, %cst_16 {dimension_numbers = #tpu.dot_dimension_numbers<[1], [0], [0], [1], [0, 0, 1, 1], [], []>} : vector<16x64xf32>, vector<64x32xf32>, vector<16x32xf32> -> vector<16x32xf32>
      %32 = arith.addf %28, %31 : vector<16x32xf32>
      %c0_17 = arith.constant 0 : index
      %c0_18 = arith.constant 0 : index
      %33 = vector.load %arg11[%c0_17, %c0_18] : memref<16x32xf32, #tpu.memory_space<vmem>>, vector<16x32xf32>
      tpu.vector_store %arg11[%c0_17, %c0_18], %32 {strides = array<i32>} : memref<16x32xf32, #tpu.memory_space<vmem>>, vector<16x32xf32>,
    } else {
    }
    %c7_i32 = arith.constant 7 : i32
    %8 = arith.cmpi eq, %arg1, %c7_i32 : i32
    %9 = arith.extui %8 : i1 to i32
    %c0_i32_2 = arith.constant 0 : i32
    %10 = arith.cmpi ne, %9, %c0_i32_2 : i32
    scf.if %10 {
      %c0 = arith.constant 0 : index
      %c0_3 = arith.constant 0 : index
      %11 = vector.load %arg11[%c0, %c0_3] : memref<16x32xf32, #tpu.memory_space<vmem>>, vector<16x32xf32>
      %c0_4 = arith.constant 0 : index
      %c0_5 = arith.constant 0 : index
      %12 = vector.load %arg10[%c0_4, %c0_5] : memref<16x32xf32, #tpu.memory_space<vmem>>, vector<16x32xf32>
      tpu.vector_store %arg10[%c0_4, %c0_5], %11 {strides = array<i32>} : memref<16x32xf32, #tpu.memory_space<vmem>>, vector<16x32xf32>,
    } else {
    }
    return
  }
  func.func @transform_0(%arg0: i32, %arg1: i32, %arg2: memref<16xi32, #tpu.memory_space<smem>>, %arg3: memref<2xi32, #tpu.memory_space<smem>>) -> (i32, i32) {
    %c0_i32 = arith.constant 0 : i32
    %c0_i32_0 = arith.constant 0 : i32
    return %arg0, %c0_i32 : i32, i32
  }
  func.func @transform_1(%arg0: i32, %arg1: i32, %arg2: memref<16xi32, #tpu.memory_space<smem>>, %arg3: memref<2xi32, #tpu.memory_space<smem>>) -> (i32, i32, i32) {
    %c8_i32 = arith.constant 8 : i32
    %0 = arith.muli %arg0, %c8_i32 : i32
    %1 = arith.addi %0, %arg1 : i32
    %2 = arith.index_cast %1 : i32 to index
    %3 = memref.load %arg2[%2] : memref<16xi32, #tpu.memory_space<smem>>
    %c0_i32 = arith.constant 0 : i32
    %c0_i32_0 = arith.constant 0 : i32
    return %3, %arg0, %c0_i32 : i32, i32, i32
  }
  func.func @transform_2(%arg0: i32, %arg1: i32, %arg2: memref<16xi32, #tpu.memory_space<smem>>, %arg3: memref<2xi32, #tpu.memory_space<smem>>) -> (i32, i32, i32) {
    %c8_i32 = arith.constant 8 : i32
    %0 = arith.muli %arg0, %c8_i32 : i32
    %1 = arith.addi %0, %arg1 : i32
    %2 = arith.index_cast %1 : i32 to index
    %3 = memref.load %arg2[%2] : memref<16xi32, #tpu.memory_space<smem>>
    %c0_i32 = arith.constant 0 : i32
    %c0_i32_0 = arith.constant 0 : i32
    %c0_i32_1 = arith.constant 0 : i32
    return %3, %c0_i32, %c0_i32_0 : i32, i32, i32
  }
  func.func @transform_3(%arg0: i32, %arg1: i32, %arg2: memref<16xi32, #tpu.memory_space<smem>>, %arg3: memref<2xi32, #tpu.memory_space<smem>>) -> (i32, i32, i32) {
    %c8_i32 = arith.constant 8 : i32
    %0 = arith.muli %arg0, %c8_i32 : i32
    %1 = arith.addi %0, %arg1 : i32
    %2 = arith.index_cast %1 : i32 to index
    %3 = memref.load %arg2[%2] : memref<16xi32, #tpu.memory_space<smem>>
    %c0_i32 = arith.constant 0 : i32
    %c0_i32_0 = arith.constant 0 : i32
    %c0_i32_1 = arith.constant 0 : i32
    return %3, %c0_i32, %c0_i32_0 : i32, i32, i32
  }
  func.func @transform_4(%arg0: i32, %arg1: i32, %arg2: memref<16xi32, #tpu.memory_space<smem>>, %arg3: memref<2xi32, #tpu.memory_space<smem>>) -> (i32, i32) {
    %c0_i32 = arith.constant 0 : i32
    %c0_i32_0 = arith.constant 0 : i32
    %c0_i32_1 = arith.constant 0 : i32
    return %c0_i32, %c0_i32_0 : i32, i32
  }
  func.func @transform_5(%arg0: i32, %arg1: i32, %arg2: memref<16xi32, #tpu.memory_space<smem>>, %arg3: memref<2xi32, #tpu.memory_space<smem>>) -> (i32, i32) {
    %c0_i32 = arith.constant 0 : i32
    %c0_i32_0 = arith.constant 0 : i32
    %c0_i32_1 = arith.constant 0 : i32
    return %c0_i32, %c0_i32_0 : i32, i32
  }
  func.func @transform_6(%arg0: i32, %arg1: i32, %arg2: memref<16xi32, #tpu.memory_space<smem>>, %arg3: memref<2xi32, #tpu.memory_space<smem>>) -> (i32, i32) {
    %c0_i32 = arith.constant 0 : i32
    %c0_i32_0 = arith.constant 0 : i32
    return %arg0, %c0_i32 : i32, i32
  }
}

</mosaic_0001>

<bundles_post_ra>
// kernel: moe_forward.1
= control target key start
LH: loop header
LB: loop body
LE: loop exit
PB: predicated region body
PF: predicated region fallthrough
CT: control target
= control target key end

     0   :  { %s2689_s0 = inlined_call_operand.hbm [shape: s32[16], index: 0, kind: input, shape index: {}]   ;;  %s2690_s2 = inlined_call_operand.hbm [shape: f32[32,32], index: 2, kind: input, shape index: {}]   ;;  %s2691_s3 = inlined_call_operand.hbm [shape: f32[8,32,1], index: 3, kind: input, shape index: {}]   ;;  %s2692_s4 = inlined_call_operand.hbm [shape: f32[8,32,128], index: 4, kind: input, shape index: {}]   ;;  %s2693_s5 = inlined_call_operand.hbm [shape: f32[8,64,32], index: 5, kind: input, shape index: {}]   ;;  %s2694_s6 = inlined_call_operand.hbm [shape: f32[32,128], index: 6, kind: input, shape index: {}]   ;;  %s2695_s7 = inlined_call_operand.hbm [shape: f32[64,32], index: 7, kind: input, shape index: {}]   ;;  %s2696_s8 = inlined_call_operand.hbm [shape: f32[32,32], index: 8, kind: output, shape index: {}]   ;;  %s2697_s1 = inlined_call_operand.hbm [shape: s32[2], index: 1, kind: input, shape index: {}]  }
   0x1   :  { %2731 = sst [smem:[#allocation55_spill]] %s2690_s2  ;;  %s1533_s29 = scalar_lea.hbm %s2689_s0, 16 }
   0x2   :  { %2732 = sst [smem:[#allocation56_spill]] %s2691_s3  ;;  %p1534_p0 = scmp.ne.s32.totalorder %s2689_s0, %s1533_s29 }
   0x3   :  { %2733 = sst [smem:[#allocation57_spill]] %s2692_s4  ;;  %p1537_p1 = scmp.lt.u32.totalorder %s1533_s29, %s2689_s0 }
   0x4   :  { %2734 = sst [smem:[#allocation58_spill]] %s2693_s5 }
   0x5   :  { %2735 = sst [smem:[#allocation59_spill]] %s2694_s6  ;;  %p1539_p2 = pnand %p1537_p1, %p1534_p0 }
   0x6   :  { %2736 = sst [smem:[#allocation60_spill]] %s2695_s7 }
   0x7   :  { %2737 = sst [smem:[#allocation61_spill]] %s2696_s8 }
   0x8   :  { %1542 = shalt.err (!%p1539_p2)  }
   0x9   :  { %s1923_s12 = smov [#allocation4]   ;;  %s1543_s17 = scalar_lea.hbm %s2697_s1, 16 }
   0xa   :  { %14 = dma.hbm_to_smem %s2689_s0, 16, %s1923_s12, [#allocation3] }
   0xb   :  { %p1544_p3 = scmp.ne.s32.totalorder %s2697_s1, %s1543_s17  ;;  %p1547_p4 = scmp.lt.u32.totalorder %s1543_s17, %s2697_s1 }
   0xd   :  { %p1549_p5 = pnand %p1547_p4, %p1544_p3 }
   0xf   :  { %1552 = shalt.err (!%p1549_p5)  }
  0x10   :  { %s1924_s22 = smov [#allocation5]  }
  0x11   :  { %16 = dma.hbm_to_smem %s2697_s1, 16, %s1924_s22, [#allocation3] }
  0x12   :  { %1825 = dma.done.wait [#allocation3], 32 }
  0x13   :  { %1826 = vsyncadd [#allocation3], 4294967264 }
  0x14   :  { %18 = sfence }
  0x15   :  { %19 = vsyncpa [#allocation7], 0 }
  0x16   :  { %21 = vsyncpa [#allocation7 + $0x1], 0 }
  0x17   :  { %22 = vsyncpa [#allocation10], 0 }
  0x18   :  { %24 = vsyncpa [#allocation10 + $0x1], 0 }
  0x19   :  { %25 = vsyncpa [#allocation13], 0 }
  0x1a   :  { %27 = vsyncpa [#allocation13 + $0x1], 0 }
  0x1b   :  { %28 = vsyncpa [#allocation16], 0 }
  0x1c   :  { %29 = vsyncpa [#allocation8], 0 }
  0x1d   :  { %31 = vsyncpa [#allocation8 + $0x1], 0  ;;  %s2008_s0 = smov 0   ;;  %s2010_s25 = smov 0  }
  0x1e   :  { %s2012_s26 = smov 0   ;;  %s2014_s27 = smov 0  }
  0x1f   :  { %s2016_s1 = smov 0   ;;  %s2018_s28 = smov 0  }
  0x20   :  { %s2020_s29 = smov 0   ;;  %s2022_s30 = smov 0  }
  0x21   :  { %s2024_s9 = smov 0   ;;  %s2026_s10 = smov 0  }
  0x22   :  { %s2028_s11 = smov 0   ;;  %s2030_s12 = smov 0  }
  0x23   :  { %s2032_s13 = smov 0   ;;  %s2034_s14 = smov 0  }
  0x24   :  { %s2036_s15 = smov 0   ;;  %s2038_s16 = smov 0  }
  0x25   :  { %s2040_s17 = smov 0  }
  0x26 LB: > { %2738 = sst [smem:[#allocation32_spill]] %s1857_s0  ;;  %s2094_s18 = sadd.s32 4294967295, %s1921_s17   ;;  %s1921_s17 = sphi %s2040_s17, %s37_s17   ;;  %s1917_s16 = sphi %s2038_s16, %s2849_s16   ;;  %s1913_s15 = sphi %s2036_s15, %s2848_s15   ;;  %s1909_s14 = sphi %s2034_s14, %s2847_s14   ;;  %s1905_s13 = sphi %s2032_s13, %s2846_s13   ;;  %s1901_s12 = sphi %s2030_s12, %s2845_s12   ;;  %s1897_s11 = sphi %s2028_s11, %s2855_s11   ;;  %s1893_s10 = sphi %s2026_s10, %s2854_s10   ;;  %s1889_s9 = sphi %s2024_s9, %s2843_s9   ;;  %s1885_s30 = sphi %s2022_s30, %s2842_s30   ;;  %s1881_s29 = sphi %s2020_s29, %s2841_s29   ;;  %s1877_s28 = sphi %s2018_s28, %s2840_s28   ;;  %s1873_s1 = sphi %s2016_s1, %s2853_s1   ;;  %s1869_s27 = sphi %s2014_s27, %s2852_s27   ;;  %s1865_s26 = sphi %s2012_s26, %s2851_s26   ;;  %s1861_s25 = sphi %s2010_s25, %s2838_s25   ;;  %s1857_s0 = sphi %s2008_s0, %s2837_s0  }
  0x27   : > { %2739 = sst [smem:[#allocation33_spill]] %s1861_s25  ;;  %p1117_p6 = scmp.ge.s32.totalorder %s1921_s17, 1 }
  0x28   : > { %2740 = sst [smem:[#allocation34_spill]] %s1865_s26  ;;  %p2700_p7 = scmp.eq.s32.totalorder %s2094_s18, 0 }
  0x29   : > { %2741 = sst [smem:[#allocation35_spill]] %s1869_s27  ;;  %p246_p8 = scmp.lt.s32.totalorder %s1921_s17, 17 }
  0x2a   : > { %2742 = sst [smem:[#allocation36_spill]] %s1877_s28  ;;  %s1925_s20 = smov [#allocation14]  }
  0x2b   : > { %2743 = sst [smem:[#allocation37_spill]] %s1885_s30  ;;  %p2099_p9 = pnand %p1117_p6, %p246_p8 }
  0x2c   : > { %2744 = sst [smem:[#allocation38_spill]] %s1889_s9  ;;  %s258_s21 = sshll.u32 %s1925_s20, 4  ;;  %s259_s21 = int_to_ptr.vmem [resolvable:$true] %s258_s21 }
  0x2d   : > { %2745 = sst [smem:[#allocation39_spill]] %s1893_s10  ;;  %p1333_p10 = pneg %p2099_p9 }
  0x2e   : > { %2746 = sst [smem:[#allocation40_spill]] %s1901_s12 }
  0x2f   : > { %2747 = sst [smem:[#allocation41_spill]] %s1905_s13  ;;  %p2107_p11 = pnand %p1333_p10, %p2700_p7 }
  0x30   : > { %2748 = sst [smem:[#allocation42_spill]] %s1909_s14  ;;  %s2754_s6 = sld [smem:[#allocation59_spill]] }
  0x31   : > { %2749 = sst [smem:[#allocation43_spill]] %s1913_s15  ;;  %p1555_p13 = pneg %p2107_p11 }
  0x32   : > { %2750 = sst [smem:[#allocation44_spill]] %s1917_s16 }
  0x33   : > { %s2751_s19 = scalar_select %p2099_p9, 1, 0 }
  0x35   : > { %2752 = sst [smem:[#allocation45_spill]] %s2751_s19 }
  0x36   : > { %s1553_s8 = scalar_lea.hbm %s2754_s6, 512 }
  0x37   : > { %p1554_p12 = scmp.ne.s32.totalorder %s2754_s6, %s1553_s8  ;;  %p1560_p2 = scmp.lt.u32.totalorder %s1553_s8, %s2754_s6 }
  0x39   : > { %p1556_p0 = pnand %p1555_p13, %p1554_p12 }
  0x3b   : > { %p1557_p1 = pneg %p1556_p0 }
  0x3d   : > { %p1562_p3 = pnand %p1560_p2, %p1557_p1 }
  0x3f   : > { %1565 = shalt.err (!%p1562_p3)
}
  0x40   : > { %s1566_s23 = scalar_lea.vmem %s259_s21, 512  ;;  %p1574_p8 = scmp.lt.s32.totalorder %s259_s21, %s259_s21 }
  0x41   : > { %p1567_p4 = scmp.ne.s32.totalorder %s259_s21, %s1566_s23  ;;  %p1575_p10 = scmp.lt.s32.totalorder %s1566_s23, %s1566_s23 }
  0x43   : > { %p1569_p5 = pnand %p1567_p4, %p1555_p13  ;;  %p1576_p7 = por %p1575_p10, %p1574_p8 }
  0x45   : > { %p1570_p6 = pneg %p1569_p5 }
  0x47   : > { %p1577_p9 = pnand %p1576_p7, %p1570_p6 }
  0x49   : > { %1580 = shalt.err (!%p1577_p9)
}
  0x4a   : > { %s2703_s13 = smov 128   ;;  %s2705_s8 = smov 8  }
  0x4b   : > { %1336 = dma.hbm_to_vmem [thread:$0]  (!%p2107_p11), %s2754_s6, 512, %s259_s21, [#allocation13], %s2703_s13, %s2703_s13, %s2705_s8  }
  0x4c   : > { %p2717_p7 = scmp.lt.s32.totalorder %s1921_s17, 16  ;;  %s46_s24 = sadd.s32 1, %s1913_s15 }
  0x4d   : > { %p47_p9 = scmp.ge.s32.totalorder %s46_s24, 8  ;;  %s49_s20 = sadd.s32 1, %s1917_s16 }
  0x4e   : > { %p2718_p12 = scmp.eq.s32.totalorder %s1921_s17, 0  ;;  %s1111_s23 = sshll.u32 %s1917_s16, 3 }
  0x4f   : > { %s2857_s20 = smov (!%p47_p9, %s49_s20), %s1917_s16  ;;  %s2859_s24 = smov (%p47_p9, %s46_s24), 0 }
  0x50   : > { %2755 = sst [smem:[#allocation46_spill]] %s2859_s24  ;;  %p51_p0 = scmp.ge.s32.totalorder %s2857_s20, 2 }
  0x51   : > { %s2146_s14 = sadd.s32 %s1913_s15, %s1111_s23  ;;  %p97_p1 = scmp.ne.s32.totalorder %s1889_s9, %s1885_s30 }
  0x52   : > { %p103_p2 = scmp.ne.s32.totalorder %s1885_s30, %s1881_s29  ;;  %s2861_s20 = smov (%p51_p0, %s2857_s20), 0 }
  0x53   : > { %2756 = sst [smem:[#allocation47_spill]] %s2861_s20  ;;  %p2757_p3 = scmp.eq.s32.totalorder %s2094_s18, 0 }
  0x54   : > { %s81_s21 = sld [smem:[#allocation4 + %s2146_s14]]  ;;  %s1112_s13 = sshll.u32 %s2861_s20, 3 }
  0x55   : > { %p2157_p4 = por %p103_p2, %p2757_p3  ;;  %s2164_s5 = sadd.s32 %s1112_s13, %s2859_s24 }
  0x56   : > { %2760 = sst [smem:[#allocation49_spill]] %s2164_s5  ;;  %p2168_p5 = por %p97_p1, %p2718_p12 }
  0x57   : > { %s2758_s19 = scalar_select %p2157_p4, 1, 0 }
  0x58   : > { %s2174_s23 = ssub.s32 %s1917_s16, %s2861_s20  ;;  %s84_s8 = sld [smem:[#allocation4 + %s2164_s5]] }
  0x59   : > { %2759 = sst [smem:[#allocation48_spill]] %s2758_s19  ;;  %s308_s13 = sand.u32 1, %s1889_s9  }
  0x5a   : > { %s2179_s6 = sld [smem:[#allocation4 + %s2164_s5]]  ;;  %s1124_s24 = sshll.u32 %s308_s13, 4 }
  0x5b   : > { %p2185_p6 = pnand %p2717_p7, %p2168_p5  ;;  %s1126_s20 = sshll.u32 %s1917_s16, 1 }
  0x5c   : > { %s1314_s19 = scalar_select %p2168_p5, [#allocation4], [#allocation18] }
  0x5d   : > { %s2763_s15 = scalar_select %p2185_p6, 1, 0 }
  0x5e   : > { %s1315_s30 = scalar_select %p2168_p5, %s2146_s14, 0 }
  0x5f   : > { %s85_s4 = ssub.s32 %s81_s21, %s84_s8  ;;  %s310_s26 = scalar_lea.vmem [#allocation9], %s1124_s24 }
  0x60   : > { %2762 = sst [smem:[#allocation50_spill]] %s2179_s6  ;;  %s87_s0 = sor.u32 %s85_s4, %s2174_s23 }
  0x61   : > { %s322_s25 = sshll.u32 %s310_s26, 4  ;;  %p88_p8 = scmp.eq.s32.totalorder %s87_s0, 0  ;;  %s2205_s25 = int_to_ptr.vmem [resolvable:$true] %s322_s25 }
  0x62   : > { %s2863_s19 = smov (!%p2717_p7, %s1314_s19), [#allocation21]  ;;  %s2764_s13 = sadd.s32 1, %s1889_s9 }
  0x63   : > { %s2201_s6 = scalar_select %p88_p8, %s1889_s9, %s2764_s13  }
  0x64   : > { %s2865_s30 = smov (!%p2717_p7, %s1315_s30), 0  ;;  %s1928_s27 = smov [#allocation15]  }
  0x65   : > { %2765 = sst [smem:[#allocation51_spill]] %s2201_s6  ;;  %s271_s29 = sshll.u32 %s1928_s27, 4  ;;  %s272_s29 = int_to_ptr.vmem [resolvable:$true] %s271_s29 }
  0x66   : > { %s313_s5 = sld [smem:[%s2863_s19 + %s2865_s30]] }
  0x67   : > { %s2766_s7 = sld [smem:[#allocation60_spill]] }
  0x6d   : > { %s1581_s4 = scalar_lea.hbm %s2766_s7, 1024 }
  0x6e   : > { %p1582_p10 = scmp.ne.s32.totalorder %s2766_s7, %s1581_s4  ;;  %p1588_p1 = scmp.lt.u32.totalorder %s1581_s4, %s2766_s7 }
  0x70   : > { %p1584_p9 = pnand %p1582_p10, %p1555_p13 }
  0x72   : > { %p1585_p0 = pneg %p1584_p9 }
  0x74   : > { %p1590_p2 = pnand %p1588_p1, %p1585_p0 }
  0x76   : > { %1593 = shalt.err (!%p1590_p2)
}
  0x77   : > { %s1594_s27 = scalar_lea.vmem %s272_s29, 1024  ;;  %p1602_p7 = scmp.lt.s32.totalorder %s272_s29, %s272_s29 }
  0x78   : > { %p1595_p3 = scmp.ne.s32.totalorder %s272_s29, %s1594_s27  ;;  %p1603_p12 = scmp.lt.s32.totalorder %s1594_s27, %s1594_s27 }
  0x7a   : > { %p1597_p5 = pnand %p1595_p3, %p1555_p13  ;;  %p1604_p4 = por %p1603_p12, %p1602_p7 }
  0x7c   : > { %p1598_p8 = pneg %p1597_p5 }
  0x7e   : > { %p1605_p6 = pnand %p1604_p4, %p1598_p8 }
  0x80   : > { %1608 = shalt.err (!%p1605_p6)
}
  0x81   : > { %s2767_s30 = smov 8   ;;  %s2768_s19 = smov 128  }
  0x82   : > { %1339 = dma.hbm_to_vmem [thread:$0]  (!%p2107_p11), %s2766_s7, 1024, %s272_s29, [#allocation16], %s2768_s19, %s2768_s19, %s2767_s30  }
  0x83   : > { %s1110_s4 = sadd.s32 4294967294, %s1921_s17   ;;  %s1127_s22 = sshll.u32 %s313_s5, 2 }
  0x84   : > { %p54_p13 = scmp.eq.s32.totalorder %s2174_s23, 0  ;;  %s319_s24 = sadd.s32 %s1127_s22, %s1126_s20 }
  0x85   : > { %s56_s26 = sadd.s32 1, %s1901_s12  ;;  %s1128_s0 = sshll.u32 %s319_s24, 7 }
  0x86   : > { %s2769_s3 = sld [smem:[#allocation56_spill]]  ;;  %s2770_s21 = sand.u32 1, %s1921_s17  }
  0x87   : > { %s2246_s29 = scalar_lea.sflag [#allocation10], %s2770_s21  ;;  %p2771_p4 = scmp.ne.s32.totalorder %s2763_s15, 0 }
  0x89   : > { %p1611_p6 = pneg %p2771_p4 }
  0x8c   : > { %s2240_s8 = scalar_lea.hbm %s2769_s3, %s1128_s0  ;;  %s1614_s24 = scalar_lea.hbm %s2769_s3, 4096 }
  0x8d   : > { %s1609_s5 = scalar_lea.hbm %s2240_s8, 256  ;;  %p1615_p0 = scmp.lt.u32.totalorder %s2240_s8, %s2769_s3 }
  0x8e   : > { %p1610_p11 = scmp.ne.s32.totalorder %s2240_s8, %s1609_s5  ;;  %p1616_p1 = scmp.lt.u32.totalorder %s1614_s24, %s1609_s5 }
  0x8f   : > { %p1618_p3 = scmp.lt.u32.totalorder %s1609_s5, %s2240_s8 }
  0x90   : > { %p1612_p10 = pnand %p1611_p6, %p1610_p11  ;;  %p1617_p2 = por %p1616_p1, %p1615_p0 }
  0x92   : > { %p1613_p9 = pneg %p1612_p10  ;;  %p1619_p5 = por %p1618_p3, %p1617_p2 }
  0x94   : > { %p1620_p8 = pnand %p1619_p5, %p1613_p9 }
  0x96   : > { %1623 = shalt.err (!%p1620_p8)
}
  0x97   : > { %s1624_s27 = scalar_lea.vmem %s2205_s25, 256  ;;  %s1929_s21 = smov [#allocation9]  }
  0x98   : > { %p1625_p11 = scmp.ne.s32.totalorder %s2205_s25, %s1624_s27  ;;  %s1629_s20 = sshll.u32 %s1929_s21, 4  ;;  %s1630_s20 = int_to_ptr.vmem [resolvable:$false] %s1629_s20 }
  0x99   : > { %s1631_s22 = scalar_lea.vmem %s1630_s20, 512  ;;  %p1632_p7 = scmp.lt.s32.totalorder %s2205_s25, %s1630_s20 }
  0x9a   : > { %p1627_p10 = pnand %p1625_p11, %p1611_p6  ;;  %p1633_p0 = scmp.lt.s32.totalorder %s1631_s22, %s1624_s27 }
  0x9c   : > { %p1628_p12 = pneg %p1627_p10  ;;  %p1634_p1 = por %p1633_p0, %p1632_p7 }
  0x9e   : > { %p1635_p2 = pnand %p1634_p1, %p1628_p12 }
  0xa0   : > { %1638 = shalt.err (!%p1635_p2)
}
  0xa1   : > { %1348 = dma.hbm_to_vmem [thread:$0]  (!%p2771_p4), %s2240_s8, 256, %s2205_s25, %s2246_s29, %s2768_s19, %s2768_s19, %s2767_s30  }
  0xa2   : > { %s2282_s15 = scalar_select %p54_p13, %s1901_s12, %s56_s26  }
  0xa3   : > { %p2773_p7 = scmp.ne.s32.totalorder %s1901_s12, %s1897_s11  ;;  %p2774_p12 = scmp.eq.s32.totalorder %s1921_s17, 0 }
  0xa4   : > { %2772 = sst [smem:[#allocation52_spill]] %s2282_s15  ;;  %p2775_p9 = scmp.ne.s32.totalorder %s1897_s11, %s1893_s10 }
  0xa5   : > { %p65_p6 = por %p2774_p12, %p2773_p7  ;;  %p2776_p3 = scmp.eq.s32.totalorder %s2094_s18, 0 }
  0xa6   : > { %p233_p8 = scmp.eq.s32.totalorder %s2094_s18, 15  ;;  %p239_p11 = scmp.eq.s32.totalorder %s1110_s4, 15 }
  0xa7   : > { %p2294_p5 = por %p2776_p3, %p2775_p9  ;;  %s285_s24 = sand.u32 1, %s1901_s12  }
  0xa8   : > { %s1165_s0 = sshll.u32 %s1917_s16, 8  ;;  %p2778_p10 = pmov %p2773_p7 }
  0xa9   : > { %s2777_s5 = scalar_select %p2294_p5, 1, 0 }
  0xaa   : > { %p2306_p4 = por %p233_p8, %p2778_p10  ;;  %p2780_p13 = pmov %p2775_p9 }
  0xab   : > { %s1121_s26 = sshll.u32 %s285_s24, 4  ;;  %s2783_s2 = sld [smem:[#allocation55_spill]] }
  0xac   : > { %s2779_s25 = scalar_select %p2306_p4, 1, 0 }
  0xad   : > { %p2313_p0 = por %p239_p11, %p2780_p13  ;;  %s289_s4 = scalar_lea.vmem [#allocation6], %s1121_s26 }
  0xae   : > { %s296_s21 = sshll.u32 %s289_s4, 4  ;;  %p2784_p1 = scmp.lt.s32.totalorder %s1921_s17, 16  ;;  %s2328_s21 = int_to_ptr.vmem [resolvable:$true] %s296_s21 }
  0xaf   : > { %s2781_s23 = scalar_select %p2313_p0, 1, 0 }
  0xb0   : > { %p2324_p2 = pnand %p2784_p1, %p65_p6  ;;  %s2330_s22 = scalar_lea.sflag [#allocation7], %s285_s24 }
  0xb1   : > { %2782 = sst [smem:[#allocation53_spill]] %s2781_s23  ;;  %s2320_s27 = scalar_lea.hbm %s2783_s2, %s1165_s0 }
  0xb2   : > { %s1639_s8 = scalar_lea.hbm %s2320_s27, 256  ;;  %p1641_p12 = pneg %p2324_p2 }
  0xb3   : > { %p1640_p7 = scmp.ne.s32.totalorder %s2320_s27, %s1639_s8  ;;  %s1644_s13 = scalar_lea.hbm %s2783_s2, 512 }
  0xb4   : > { %p1645_p6 = scmp.lt.u32.totalorder %s2320_s27, %s2783_s2  ;;  %p1646_p8 = scmp.lt.u32.totalorder %s1644_s13, %s1639_s8 }
  0xb5   : > { %p1642_p9 = pnand %p1641_p12, %p1640_p7  ;;  %p1648_p10 = scmp.lt.u32.totalorder %s1639_s8, %s2320_s27 }
  0xb6   : > { %p1647_p11 = por %p1646_p8, %p1645_p6 }
  0xb7   : > { %p1643_p3 = pneg %p1642_p9 }
  0xb8   : > { %p1649_p13 = por %p1648_p10, %p1647_p11 }
  0xba   : > { %p1650_p1 = pnand %p1649_p13, %p1643_p3 }
  0xbc   : > { %1653 = shalt.err (!%p1650_p1)
}
  0xbd   : > { %s1654_s24 = scalar_lea.vmem %s2328_s21, 256  ;;  %s1930_s0 = smov [#allocation6]  }
  0xbe   : > { %p1655_p7 = scmp.ne.s32.totalorder %s2328_s21, %s1654_s24  ;;  %s1659_s26 = sshll.u32 %s1930_s0, 4  ;;  %s1660_s26 = int_to_ptr.vmem [resolvable:$false] %s1659_s26 }
  0xbf   : > { %s1661_s3 = scalar_lea.vmem %s1660_s26, 512  ;;  %p1662_p4 = scmp.lt.s32.totalorder %s2328_s21, %s1660_s26 }
  0xc0   : > { %p1657_p9 = pnand %p1655_p7, %p1641_p12  ;;  %p1663_p6 = scmp.lt.s32.totalorder %s1661_s3, %s1654_s24 }
  0xc2   : > { %p1658_p0 = pneg %p1657_p9  ;;  %p1664_p8 = por %p1663_p6, %p1662_p4 }
  0xc4   : > { %p1665_p11 = pnand %p1664_p8, %p1658_p0 }
  0xc6   : > { %1668 = shalt.err (!%p1665_p11)
}
  0xc7   : > { %s2786_s8 = sld [smem:[#allocation35_spill]]  ;;  %s2787_s13 = sld [smem:[#allocation49_spill]] }
  0xc8   : > { %s2788_s4 = sld [smem:[#allocation50_spill]]  ;;  %p129_p4 = scmp.ne.s32.totalorder %s1877_s28, %s1873_s1 }
  0xc9   : > { %1343 = dma.hbm_to_vmem [thread:$0]  (!%p2324_p2), %s2320_s27, 256, %s2328_s21, %s2330_s22, %s2768_s19, %s2768_s19, %s2767_s30  }
  0xca   : > { %s115_s20 = sld [smem:[#allocation4 + %s2146_s14]]  ;;  %s334_s0 = sand.u32 1, %s1877_s28  }
  0xcb   : > { %s122_s26 = sadd.s32 1, %s1877_s28  ;;  %p2789_p12 = scmp.eq.s32.totalorder %s2094_s18, 0 }
  0xcc   : > { %s2790_s3 = sld [smem:[#allocation33_spill]]  ;;  %s2791_s2 = sld [smem:[#allocation34_spill]] }
  0xcd   : > { %p135_p0 = scmp.ne.s32.totalorder %s1873_s1, %s2786_s8  ;;  %s2367_s24 = sld [smem:[#allocation4 + %s2787_s13]] }
  0xce   : > { %p2793_p10 = scmp.eq.s32.totalorder %s1921_s17, 0  ;;  %s2794_s16 = sld [smem:[#allocation32_spill]] }
  0xcf   : > { %p2373_p3 = por %p135_p0, %p2789_p12  ;;  %s1129_s27 = sshll.u32 %s334_s0, 5 }
  0xd0   : > { %p131_p2 = por %p129_p4, %p2793_p10  ;;  %s119_s21 = ssub.s32 %s115_s20, %s2788_s4 }
  0xd1   : > { %s2792_s7 = scalar_select %p2373_p3, 1, 0 }
  0xd2   : > { %p120_p13 = scmp.eq.s32.totalorder %s119_s21, 0  ;;  %p2795_p1 = scmp.lt.s32.totalorder %s1921_s17, 16 }
  0xd3   : > { %s1317_s8 = scalar_select %p131_p2, [#allocation4], [#allocation19] }
  0xd4   : > { %p2382_p7 = pnand %p2795_p1, %p131_p2  ;;  %p2798_p9 = pmov %p2795_p1 }
  0xd5   : > { %s2387_s13 = scalar_select %p120_p13, %s1877_s28, %s122_s26  }
  0xd6   : > { %s1318_s15 = scalar_select %p131_p2, %s2146_s14, 0 }
  0xd7   : > { %2797 = sst [smem:[#allocation54_spill]] %s2387_s13  ;;  %s2867_s8 = smov (!%p2798_p9, %s1317_s8), [#allocation22] }
  0xd8   : > { %p2799_p6 = pmov %p2795_p1  ;;  %s336_s4 = scalar_lea.vmem [#allocation11], %s1129_s27 }
  0xd9   : > { %s346_s20 = sshll.u32 %s336_s4, 4  ;;  %s2395_s21 = sld [smem:[#allocation4 + %s2146_s14]]  ;;  %s2401_s20 = int_to_ptr.vmem [resolvable:$true] %s346_s20 }
  0xda   : > { %s2869_s15 = smov (!%p2799_p6, %s1318_s15), 0  ;;  %p161_p8 = scmp.ne.s32.totalorder %s2791_s2, %s2790_s3 }
  0xdb   : > { %s339_s0 = sld [smem:[%s2867_s8 + %s2869_s15]]  ;;  %p167_p11 = scmp.ne.s32.totalorder %s2790_s3, %s2794_s16 }
  0xdc   : > { %p2800_p4 = pmov %p2789_p12  ;;  %s358_s6 = sand.u32 1, %s2791_s2  }
  0xdd   : > { %s2802_s28 = sld [smem:[#allocation57_spill]]  ;;  %p2804_p12 = pmov %p2793_p10 }
  0xde   : > { %p2405_p0 = por %p167_p11, %p2800_p4  ;;  %p1671_p13 = pneg %p2382_p7 }
  0xdf   : > { %p2417_p10 = por %p161_p8, %p2804_p12 }
  0xe0   : > { %s2801_s26 = scalar_select %p2405_p0, 1, 0 }
  0xe1   : > { %s1166_s12 = sshll.u32 %s339_s0, 9 }
  0xe3   : > { %s2803_s23 = smov %s2802_s28  ;;  %s2413_s10 = scalar_lea.hbm %s2802_s28, %s1166_s12 }
  0xe4   : > { %s1669_s15 = scalar_lea.hbm %s2413_s10, 512  ;;  %s1674_s12 = scalar_lea.hbm %s2803_s23, 4096 }
  0xe5   : > { %p1670_p2 = scmp.ne.s32.totalorder %s2413_s10, %s1669_s15  ;;  %p1675_p6 = scmp.lt.u32.totalorder %s2413_s10, %s2803_s23 }
  0xe6   : > { %p1676_p8 = scmp.lt.u32.totalorder %s1674_s12, %s1669_s15  ;;  %p1678_p4 = scmp.lt.u32.totalorder %s1669_s15, %s2413_s10 }
  0xe7   : > { %p1672_p1 = pnand %p1671_p13, %p1670_p2 }
  0xe8   : > { %p1677_p11 = por %p1676_p8, %p1675_p6 }
  0xe9   : > { %p1673_p9 = pneg %p1672_p1 }
  0xea   : > { %p1679_p12 = por %p1678_p4, %p1677_p11 }
  0xec   : > { %p1680_p0 = pnand %p1679_p12, %p1673_p9 }
  0xee   : > { %1683 = shalt.err (!%p1680_p0)
}
  0xef   : > { %s1684_s8 = scalar_lea.vmem %s2401_s20, 512  ;;  %s1931_s13 = smov [#allocation11]  }
  0xf0   : > { %p1685_p2 = scmp.ne.s32.totalorder %s2401_s20, %s1684_s8  ;;  %s1689_s0 = sshll.u32 %s1931_s13, 4  ;;  %s1690_s0 = int_to_ptr.vmem [resolvable:$false] %s1689_s0 }
  0xf1   : > { %s1691_s4 = scalar_lea.vmem %s1690_s0, 1024  ;;  %p1692_p5 = scmp.lt.s32.totalorder %s2401_s20, %s1690_s0 }
  0xf2   : > { %p1687_p1 = pnand %p1685_p2, %p1671_p13  ;;  %p1693_p6 = scmp.lt.s32.totalorder %s1691_s4, %s1684_s8 }
  0xf4   : > { %p1688_p3 = pneg %p1687_p1  ;;  %p1694_p8 = por %p1693_p6, %p1692_p5 }
  0xf6   : > { %p1695_p11 = pnand %p1694_p8, %p1688_p3 }
  0xf8   : > { %1698 = shalt.err (!%p1695_p11)
}
  0xf9   : > { %1353 = dma.hbm_to_vmem [thread:$0]  (!%p2382_p7), %s2413_s10, 512, %s2401_s20, %s2246_s29, %s2768_s19, %s2768_s19, %s2767_s30  }
  0xfa   : > { %s151_s22 = ssub.s32 %s2395_s21, %s2367_s24  ;;  %s154_s15 = sadd.s32 1, %s2791_s2 }
  0xfb   : > { %p152_p5 = scmp.eq.s32.totalorder %s151_s22, 0  ;;  %s1133_s9 = sshll.u32 %s358_s6, 6 }
  0xfc   : > { %s1320_s28 = scalar_select %p2417_p10, [#allocation4], [#allocation20] }
  0xfd   : > { %s2871_s2 = smov (!%p152_p5, %s2791_s2), %s154_s15  ;;  %s2873_s14 = smov (!%p2417_p10, %s2146_s14), 0 }
  0xfe   : > { %p2806_p3 = scmp.lt.s32.totalorder %s1921_s17, 16  ;;  %s360_s6 = scalar_lea.vmem [#allocation12], %s1133_s9 }
  0xff   : > { %s370_s24 = sshll.u32 %s360_s6, 4  ;;  %s2810_s3 = sld [smem:[#allocation58_spill]]  ;;  %s2475_s24 = int_to_ptr.vmem [resolvable:$true] %s370_s24 }
 0x100   : > { %s2875_s28 = smov (!%p2806_p3, %s1320_s28), [#allocation23]  ;;  %p2807_p0 = pmov %p2806_p3 }
 0x101   : > { %s2811_s8 = sand.u32 1, %s1921_s17  }
 0x102   : > { %s2877_s14 = smov (!%p2807_p0, %s2873_s14), 0  ;;  %p2808_p13 = pmov %p2807_p0 }
 0x103   : > { %s363_s29 = sld [smem:[%s2875_s28 + %s2877_s14]]  ;;  %s2484_s16 = scalar_lea.sflag [#allocation13], %s2811_s8 }
 0x104   : > { %p2471_p9 = pnand %p2808_p13, %p2417_p10 }
 0x105   : > { %s1704_s4 = scalar_lea.hbm %s2810_s3, 8192 }
 0x106   : > { %p1701_p10 = pneg %p2471_p9 }
 0x109   : > { %s1167_s20 = sshll.u32 %s363_s29, 10 }
 0x10a   : > { %s2480_s27 = scalar_lea.hbm %s2810_s3, %s1167_s20 }
 0x10b   : > { %s1699_s13 = scalar_lea.hbm %s2480_s27, 1024  ;;  %p1705_p2 = scmp.lt.u32.totalorder %s2480_s27, %s2810_s3 }
 0x10c   : > { %p1700_p7 = scmp.ne.s32.totalorder %s2480_s27, %s1699_s13  ;;  %p1706_p1 = scmp.lt.u32.totalorder %s1704_s4, %s1699_s13 }
 0x10d   : > { %p1708_p8 = scmp.lt.u32.totalorder %s1699_s13, %s2480_s27 }
 0x10e   : > { %p1702_p4 = pnand %p1701_p10, %p1700_p7  ;;  %p1707_p6 = por %p1706_p1, %p1705_p2 }
 0x110   : > { %p1703_p12 = pneg %p1702_p4  ;;  %p1709_p11 = por %p1708_p8, %p1707_p6 }
 0x112   : > { %p1710_p5 = pnand %p1709_p11, %p1703_p12 }
 0x114   : > { %1713 = shalt.err (!%p1710_p5)
}
 0x115   : > { %s1714_s9 = scalar_lea.vmem %s2475_s24, 1024  ;;  %s1932_s28 = smov [#allocation12]  }
 0x116   : > { %p1715_p3 = scmp.ne.s32.totalorder %s2475_s24, %s1714_s9  ;;  %s1719_s29 = sshll.u32 %s1932_s28, 4  ;;  %s1720_s29 = int_to_ptr.vmem [resolvable:$false] %s1719_s29 }
 0x117   : > { %s1721_s6 = scalar_lea.vmem %s1720_s29, 2048  ;;  %p1722_p7 = scmp.lt.s32.totalorder %s2475_s24, %s1720_s29 }
 0x118   : > { %p1717_p0 = pnand %p1715_p3, %p1701_p10  ;;  %p1723_p4 = scmp.lt.s32.totalorder %s1721_s6, %s1714_s9 }
 0x11a   : > { %p1718_p13 = pneg %p1717_p0  ;;  %p1724_p2 = por %p1723_p4, %p1722_p7 }
 0x11c   : > { %p1725_p1 = pnand %p1724_p2, %p1718_p13 }
 0x11e   : > { %1728 = shalt.err (!%p1725_p1)
}
 0x11f   : > { %1358 = dma.hbm_to_vmem [thread:$0]  (!%p2471_p9), %s2480_s27, 1024, %s2475_s24, %s2484_s16, %s2768_s19, %s2768_s19, %s2767_s30  }
 0x120   : > { %s2812_s20 = sld [smem:[#allocation45_spill]] }
 0x126   : > { %p2813_p10 = scmp.ne.s32.totalorder %s2812_s20, 0 }
 0x127   : > { %s2518_s21 = sand.u32 (!%p2813_p10), 1, %s1897_s11   ;;  %p2814_p12 = scmp.ne.s32.totalorder (!%p2813_p10), %s2777_s5, 0 }
 0x128   : > { %382 = sbr.rel (%p2813_p10) target bundleno = 1520 (0x5f0), region = 44  ;;  %s1138_s12 = sshll.u32 (!%p2813_p10), %s2518_s21, 4 }
 0x129   : > { %s385_s8 = scalar_lea.sflag (!%p2813_p10), [#allocation7], %s2518_s21  ;;  %s2522_s13 = scalar_lea.vmem (!%p2813_p10), [#allocation6], %s1138_s12 }
 0x12f   : > { %1828 = dma.done.wait (%p2814_p12), %s385_s8, 256  }
 0x130   : > { %1830 = vsyncadd (%p2814_p12), %s385_s8, 4294967040  ;;  %s2815_s30 = sld [smem:[#allocation37_spill]]  ;;  %s393_s10 = sand.u32 1, %s2094_s18  }
 0x131   : > { %s2816_s19 = sld [smem:[#allocation48_spill]]  ;;  %s394_s16 = scalar_lea.sflag [#allocation10], %s393_s10 }
 0x136   : > { %s395_s24 = sand.u32 1, %s2815_s30  }
 0x137   : > { %s2530_s27 = sshll.u32 %s395_s24, 4  ;;  %p2817_p9 = scmp.ne.s32.totalorder %s2816_s19, 0 }
 0x138   : > { %s397_s14 = scalar_lea.vmem [#allocation9], %s2530_s27 }
 0x139   : > { %1832 = dma.done.wait (%p2817_p9), %s394_s16, 256  }
 0x13a   : > { %1834 = vsyncadd (%p2817_p9), %s394_s16, 4294967040  ;;  %s404_s0 = sand.u32 1, %s1873_s1   ;;  %p2818_p6 = scmp.ne.s32.totalorder %s2792_s7, 0 }
 0x13b   : > { %s1140_s5 = sshll.u32 %s404_s0, 5 }
 0x13c   : > { %s2538_s4 = scalar_lea.vmem [#allocation11], %s1140_s5 }
 0x13d   : > { %1836 = dma.done.wait (%p2818_p6), %s394_s16, 512  }
 0x13e   : > { %1838 = vsyncadd (%p2818_p6), %s394_s16, 4294966784  ;;  %s2819_s22 = sld [smem:[#allocation33_spill]]  ;;  %s412_s28 = scalar_lea.sflag [#allocation13], %s393_s10 }
 0x13f   : > { %p2820_p8 = scmp.ne.s32.totalorder %s2801_s26, 0 }
 0x144   : > { %s413_s15 = sand.u32 1, %s2819_s22  }
 0x145   : > { %s1141_s9 = sshll.u32 %s413_s15, 6 }
 0x146   : > { %s2545_s29 = scalar_lea.vmem [#allocation12], %s1141_s9 }
 0x147   : > { %1840 = dma.done.wait (%p2820_p8), %s412_s28, 1024  }
 0x148   : > { %1842 = vsyncadd (%p2820_p8), %s412_s28, 4294966272  ;;  %p2821_p11 = scmp.eq.s32.totalorder %s2094_s18, 0 }
 0x14a   : > { %1844 = dma.done.wait (%p2821_p11), [#allocation13], 512   ;;  %p2822_p5 = pmov %p2821_p11 }
 0x14c   : > { %1846 = vsyncadd (%p2822_p5), [#allocation13], 4294966784  ;;  %p2823_p3 = pmov %p2822_p5 }
 0x14e   : > { %1848 = dma.done.wait (%p2823_p3), [#allocation16], 1024   ;;  %p2824_p0 = pmov %p2823_p3 }
 0x14f   : > { %s2559_s7 = scalar_lea.vmem [#allocation17], %s1138_s12  ;;  %s2825_s6 = sld [smem:[#allocation41_spill]] }
 0x150   : > { %1850 = vsyncadd (%p2824_p0), [#allocation16], 4294966272 }
 0x155   : > { %p1145_p13 = scmp.ne.s32.totalorder %s2825_s6, 0 }
 0x156   : > { %v485_v0 = vld [vmem:[#allocation14] sm:$0xff] (!%p1145_p13)  ;;  %v486_v1 = vld [vmem:[#allocation14 + $0x8] sm:$0xff] (!%p1145_p13)  ;;  %v487_v2 = vld [vmem:[#allocation14 + $0x10] sm:$0xff] (!%p1145_p13)  ;;  %vm489_vm0 = vcmask (!%p1145_p13), 261120   ;;  %s1933_s18 = smov (!%p1145_p13), 64   ;;  %vm603_vm1 = vcmask (!%p1145_p13), 523264  }
 0x157   : > { %482 = sbr.rel (%p1145_p13) target bundleno = 901 (0x385), region = 72  ;;  %v1261_v3 = vpack.c.bf16 (!%p1145_p13), %v486_v1, %v485_v0  ;;  %v488_v4 = vld [vmem:[#allocation14 + $0x18] sm:$0xff] (!%p1145_p13)  ;;  %v483_v5 = vld [vmem:[%s2522_s13] sm:$0xff] (!%p1145_p13)  ;;  %v596_v9 = vld [vmem:[#allocation15 + $0x8] sm:$0xff] (!%p1145_p13) }
 0x158   : > { %v1265_v6 = vpack.c.bf16 (!%p1145_p13), %v488_v4, %v487_v2  ;;  %1209 = vmatprep.mubr.msk.f32.mxu0 (!%p1145_p13), %vm489_vm0, %v483_v5  ;;  %v484_v7 = vld [vmem:[%s2522_s13 + $0x8] sm:$0xff] (!%p1145_p13)  ;;  %v595_v8 = vld [vmem:[#allocation15] sm:$0xff] (!%p1145_p13)  ;;  %v597_v10 = vld [vmem:[#allocation15 + $0x10] sm:$0xff] (!%p1145_p13) }
 0x159   : > { %1262 = vmatprep.subr.bf16.mxu0 (!%p1145_p13), %v1261_v3  ;;  %v1269_v11 = vpack.c.bf16 (!%p1145_p13), %v596_v9, %v595_v8  ;;  %v598_v12 = vld [vmem:[#allocation15 + $0x18] sm:$0xff] (!%p1145_p13)  ;;  %v599_v14 = vld [vmem:[#allocation15 + $0x20] sm:$0xff] (!%p1145_p13)  ;;  %v600_v15 = vld [vmem:[#allocation15 + $0x28] sm:$0xff] (!%p1145_p13) }
 0x15a   : > { %1264 = vmatpush3.bf16.msra.mxu0 (!%p1145_p13), %v1261_v3  ;;  %v1273_v13 = vpack.c.bf16 (!%p1145_p13), %v598_v12, %v597_v10  ;;  %v1277_v16 = vpack.c.bf16 (!%p1145_p13), %v600_v15, %v599_v14  ;;  %v601_v17 = vld [vmem:[#allocation15 + $0x30] sm:$0xff] (!%p1145_p13)  ;;  %v602_v18 = vld [vmem:[#allocation15 + $0x38] sm:$0xff] (!%p1145_p13) }
 0x15b   : > { %1266 = vmatprep.subr.bf16.mxu0 (!%p1145_p13), %v1265_v6  ;;  %1270 = vmatprep.subr.bf16.mxu1 (!%p1145_p13), %v1269_v11  ;;  %v1281_v19 = vpack.c.bf16 (!%p1145_p13), %v602_v18, %v601_v17 }
 0x15c   : > { %1272 = vmatpush3.bf16.msra.mxu1 (!%p1145_p13), %v1269_v11 }
 0x15d   : > { %1274 = vmatprep.subr.bf16.mxu1 (!%p1145_p13), %v1273_v13 }
 0x15e   : > { %1268 = vmatpush3.bf16.msra.mxu0 %v1265_v6 }
 0x160   : > { %1276 = vmatpush3.bf16.msra.mxu1 %v1273_v13 }
 0x161   : > { %1210 = vmatmul.mubr.msk.f32.vlgmr.msra.gmra.mrb[0].mxu0 %vm489_vm0, %v484_v7  ;;  %1278 = vmatprep.subr.bf16.mxu1 %v1277_v16 }
 0x164   : > { %1280 = vmatpush3.bf16.msra.mxu1 %v1277_v16 }
 0x165   : > { %1282 = vmatprep.subr.bf16.mxu1 %v1281_v19 }
 0x168   : > { %1284 = vmatpush3.bf16.msra.mxu1 %v1281_v19 }
 0x234   : > { %v1211_v20 = vpop.f32.mrb[0].mxu0 }
 0x235   : > { %v562_v21 = vpop.f32.mrb[1].mxu0  ;;  %v1149_v23 = vmul.f32 -1.442695, %v1211_v20 }
 0x236   : > { %587 = vrot.lane.b32.xlu0 %v562_v21, %s1933_s18  ;;  %v1148_v22 = vmul.f32 -1.442695, %v562_v21 }
 0x238   : > { %1516 = vpow2.f32 %v1148_v22 }
 0x239   : > { %1518 = vpow2.f32 %v1149_v23 }
 0x23a   : > { %589 = vrot.lane.b32.xlu0 %v1211_v20, %s1933_s18 }
 0x242   : > { %v1517_v24 = vpop.eup %1516 }
 0x243   : > { %v577_v25 = vadd.f32 1.0, %v1517_v24  ;;  %v1519_v26 = vpop.eup %1518 }
 0x244   : > { %v578_v27 = vadd.f32 1.0, %v1519_v26 }
 0x245   : > { %1520 = vrcp.f32 %v577_v25 }
 0x246   : > { %1522 = vrcp.f32 %v578_v27 }
 0x24f   : > { %v1521_v28 = vpop.eup %1520 }
 0x250   : > { %v583_v29 = vmul.f32 %v1521_v28, %v562_v21  ;;  %v1523_v30 = vpop.eup %1522 }
 0x251   : > { %v584_v33 = vmul.f32 %v1523_v30, %v1211_v20 }
 0x2a8   : > { %v588_v31 = vpop.permute.xlu0 %587 }
 0x2a9   : > { %v593_v32 = vmul.f32 %v588_v31, %v583_v29 }
 0x2ab   : > { %1228 = vmatprep.mubr.msk.f32.mxu1 %vm603_vm1, %v593_v32 }
 0x2ac   : > { %v590_v34 = vpop.permute.xlu0 %589 }
 0x2ad   : > { %v594_v35 = vmul.f32 %v590_v34, %v584_v33 }
 0x2af   : > { %1229 = vmatmul.mubr.msk.f32.vlgmr.msra.gmra.mrb[0].mxu1 %vm603_vm1, %v594_v35 }
 0x382   : > { %v1230_v36 = vpop.f32.mrb[0].mxu1 }
 0x383   : > { %686 = vst.msk [vmem:[#allocation2 + $0x8] sm:$0xff] %vm489_vm0, %v1230_v36  ;;  %v676_v37 = vpop.f32.mrb[1].mxu1 }
 0x384   : > { %685 = vst.msk [vmem:[#allocation2] sm:$0xff] %vm489_vm0, %v676_v37 }
 0x385 PF: > { %s2826_s26 = sld [smem:[#allocation42_spill]]  ;;  %s2827_s12 = sld [smem:[#allocation41_spill]] }
 0x38b   : > { %s687_s20 = sld [smem:[#allocation5 + %s2826_s26]] }
 0x391   : > { %p1152_p7 = scmp.ge.s32.totalorder %s2827_s12, %s687_s20 }
 0x392   : > { %v694_v38 = vld [vmem:[%s2538_s4] sm:$0xff] (!%p1152_p7)  ;;  %v695_v39 = vld [vmem:[%s2538_s4 + $0x8] sm:$0xff] (!%p1152_p7)  ;;  %v696_v40 = vld [vmem:[%s2538_s4 + $0x10] sm:$0xff] (!%p1152_p7)  ;;  %vm698_vm2 = vcmask (!%p1152_p7), 261120   ;;  %v1934_v44 = vmov (!%p1152_p7), 0   ;;  %s1935_s8 = smov (!%p1152_p7), 64  }
 0x393   : > { %691 = sbr.rel (%p1152_p7) target bundleno = 1477 (0x5c5), region = 76  ;;  %v1285_v41 = vpack.c.bf16 (!%p1152_p7), %v695_v39, %v694_v38  ;;  %v697_v42 = vld [vmem:[%s2538_s4 + $0x18] sm:$0xff] (!%p1152_p7)  ;;  %v692_v43 = vld [vmem:[%s2522_s13] sm:$0xff] (!%p1152_p7)  ;;  %1524 = vset.pattern.permute.xlu0 (!%p1152_p7), %v1934_v44  ;;  %v821_v50 = vld [vmem:[%s2545_s29 + $0x8] sm:$0xff] (!%p1152_p7)  ;;  %vm828_vm3 = vcmask (!%p1152_p7), 523264  }
 0x394   : > { %v1289_v45 = vpack.c.bf16 (!%p1152_p7), %v697_v42, %v696_v40  ;;  %1239 = vmatprep.mubr.msk.f32.mxu0 (!%p1152_p7), %vm698_vm2, %v692_v43  ;;  %v794_v46 = vld [vmem:[%s397_s14] sm:$0xff] (!%p1152_p7)  ;;  %v795_v47 = vld [vmem:[%s397_s14 + $0x8] sm:$0xff] (!%p1152_p7) }
 0x395   : > { %1286 = vmatprep.subr.bf16.mxu0 (!%p1152_p7), %v1285_v41  ;;  %808 = vperm.xlu0 (!%p1152_p7), %1524, %v794_v46   ;;  %v693_v48 = vld [vmem:[%s2522_s13 + $0x8] sm:$0xff] (!%p1152_p7)  ;;  %v820_v49 = vld [vmem:[%s2545_s29] sm:$0xff] (!%p1152_p7)  ;;  %v822_v51 = vld [vmem:[%s2545_s29 + $0x10] sm:$0xff] (!%p1152_p7) }
 0x396   : > { %1288 = vmatpush3.bf16.msra.mxu0 (!%p1152_p7), %v1285_v41  ;;  %v1293_v52 = vpack.c.bf16 (!%p1152_p7), %v821_v50, %v820_v49  ;;  %v823_v53 = vld [vmem:[%s2545_s29 + $0x18] sm:$0xff] (!%p1152_p7)  ;;  %v824_v55 = vld [vmem:[%s2545_s29 + $0x20] sm:$0xff] (!%p1152_p7)  ;;  %v825_v56 = vld [vmem:[%s2545_s29 + $0x28] sm:$0xff] (!%p1152_p7) }
 0x397   : > { %1290 = vmatprep.subr.bf16.mxu0 (!%p1152_p7), %v1289_v45  ;;  %v1297_v54 = vpack.c.bf16 (!%p1152_p7), %v823_v53, %v822_v51  ;;  %v1301_v57 = vpack.c.bf16 (!%p1152_p7), %v825_v56, %v824_v55  ;;  %v826_v58 = vld [vmem:[%s2545_s29 + $0x30] sm:$0xff] (!%p1152_p7)  ;;  %v827_v59 = vld [vmem:[%s2545_s29 + $0x38] sm:$0xff] (!%p1152_p7) }
 0x398   : > { %1294 = vmatprep.subr.bf16.mxu1 (!%p1152_p7), %v1293_v52  ;;  %v1305_v60 = vpack.c.bf16 (!%p1152_p7), %v827_v59, %v826_v58  ;;  %v819_v17 = vld [vmem:[#allocation2 + $0x8] sm:$0xff] (!%p1152_p7)  ;;  %v818_v18 = vld [vmem:[#allocation2] sm:$0xff] (!%p1152_p7) }
 0x399   : > { %813 = vperm.xlu0 (!%p1152_p7), %1524, %v795_v47   ;;  %1296 = vmatpush3.bf16.msra.mxu1 (!%p1152_p7), %v1293_v52 }
 0x39a   : > { %1292 = vmatpush3.bf16.msra.mxu0 %v1289_v45  ;;  %1298 = vmatprep.subr.bf16.mxu1 %v1297_v54 }
 0x39d   : > { %1240 = vmatmul.mubr.msk.f32.vlgmr.msra.gmra.mrb[0].mxu0 %vm698_vm2, %v693_v48  ;;  %1300 = vmatpush3.bf16.msra.mxu1 %v1297_v54 }
 0x39e   : > { %1302 = vmatprep.subr.bf16.mxu1 %v1301_v57 }
 0x3a1   : > { %1304 = vmatpush3.bf16.msra.mxu1 %v1301_v57 }
 0x3a2   : > { %1306 = vmatprep.subr.bf16.mxu1 %v1305_v60 }
 0x3a5   : > { %1308 = vmatpush3.bf16.msra.mxu1 %v1305_v60 }
 0x414   : > { %v809_v8 = vpop.permute.xlu0 %808 }
 0x418   : > { %v814_v15 = vpop.permute.xlu0 %813 }
 0x470   : > { %v1241_v61 = vpop.f32.mrb[0].mxu0 }
 0x471   : > { %v771_v62 = vpop.f32.mrb[1].mxu0  ;;  %v1156_v0 = vmul.f32 -1.442695, %v1241_v61 }
 0x472   : > { %798 = vrot.lane.b32.xlu1 %v771_v62, %s1935_s8  ;;  %v1155_v63 = vmul.f32 -1.442695, %v771_v62 }
 0x474   : > { %1525 = vpow2.f32 %v1155_v63 }
 0x475   : > { %1527 = vpow2.f32 %v1156_v0 }
 0x476   : > { %800 = vrot.lane.b32.xlu1 %v1241_v61, %s1935_s8 }
 0x47e   : > { %v1526_v1 = vpop.eup %1525 }
 0x47f   : > { %v786_v2 = vadd.f32 1.0, %v1526_v1  ;;  %v1528_v3 = vpop.eup %1527 }
 0x480   : > { %v787_v4 = vadd.f32 1.0, %v1528_v3 }
 0x481   : > { %1529 = vrcp.f32 %v786_v2 }
 0x482   : > { %1531 = vrcp.f32 %v787_v4 }
 0x48b   : > { %v1530_v5 = vpop.eup %1529 }
 0x48c   : > { %v792_v6 = vmul.f32 %v1530_v5, %v771_v62  ;;  %v1532_v7 = vpop.eup %1531 }
 0x48d   : > { %v793_v11 = vmul.f32 %v1532_v7, %v1241_v61 }
 0x4e4   : > { %v799_v9 = vpop.permute.xlu1 %798 }
 0x4e5   : > { %v804_v10 = vmul.f32 %v799_v9, %v792_v6 }
 0x4e7   : > { %v816_v12 = vmul.f32 %v809_v8, %v804_v10 }
 0x4e8   : > { %v801_v13 = vpop.permute.xlu1 %800 }
 0x4e9   : > { %v805_v14 = vmul.f32 %v801_v13, %v793_v11  ;;  %1258 = vmatprep.mubr.msk.f32.mxu1 %vm828_vm3, %v816_v12 }
 0x4eb   : > { %v817_v16 = vmul.f32 %v814_v15, %v805_v14 }
 0x4ed   : > { %1259 = vmatmul.mubr.msk.f32.vlgmr.msra.gmra.mrb[0].mxu1 %vm828_vm3, %v817_v16 }
 0x5c0   : > { %v1260_v19 = vpop.f32.mrb[0].mxu1 }
 0x5c1   : > { %v911_v20 = vadd.f32 %v1260_v19, %v819_v17  ;;  %v901_v21 = vpop.f32.mrb[1].mxu1 }
 0x5c2   : > { %v910_v22 = vadd.f32 %v901_v21, %v818_v18 }
 0x5c3   : > { %913 = vst.msk [vmem:[#allocation2 + $0x8] sm:$0xff] %vm698_vm2, %v911_v20 }
 0x5c4   : > { %912 = vst.msk [vmem:[#allocation2] sm:$0xff] %vm698_vm2, %v910_v22 }
 0x5c5 PF: > { %s2828_s13 = sld [smem:[#allocation41_spill]] }
 0x5cb   : > { %p1159_p4 = scmp.ne.s32.totalorder %s2828_s13, 7 }
 0x5cc   : > { %v918_v23 = vld [vmem:[#allocation2] sm:$0xff] (!%p1159_p4)  ;;  %vm920_vm4 = vcmask (!%p1159_p4), 261120   ;;  %v919_v24 = vld [vmem:[#allocation2 + $0x8] sm:$0xff] (!%p1159_p4) }
 0x5cd   : > { %917 = sbr.rel (%p1159_p4) target bundleno = 1492 (0x5d4), region = 80  ;;  %921 = vst.msk [vmem:[%s2559_s7] sm:$0xff] (!%p1159_p4), %vm920_vm4, %v918_v23  ;;  %922 = vst.msk [vmem:[%s2559_s7 + $0x8] sm:$0xff] (!%p1159_p4), %vm920_vm4, %v919_v24 }
 0x5d4 PF: > { %s2829_s30 = sld [smem:[#allocation42_spill]]  ;;  %s2830_s27 = sld [smem:[#allocation61_spill]] }
 0x5d5   : > { %s937_s14 = sshll.u32 %s2559_s7, 4  ;;  %s924_s0 = scalar_lea.sflag [#allocation8], %s2518_s21  ;;  %s2602_s14 = int_to_ptr.vmem [resolvable:$true] %s937_s14 }
 0x5d6   : > { %s1729_s4 = scalar_lea.vmem %s2602_s14, 256  ;;  %p2832_p1 = scmp.ne.s32.totalorder %s2779_s25, 0 }
 0x5d7   : > { %p1730_p2 = scmp.ne.s32.totalorder %s2602_s14, %s1729_s4  ;;  %s1936_s22 = smov [#allocation17]  }
 0x5d8   : > { %s1733_s15 = sshll.u32 %s1936_s22, 4  ;;  %s1734_s15 = int_to_ptr.vmem [resolvable:$false] %s1733_s15 }
 0x5d9   : > { %p1731_p10 = pnand %p1730_p2, %p2832_p1  ;;  %s1735_s9 = scalar_lea.vmem %s1734_s15, 512 }
 0x5da   : > { %s1168_s19 = sshll.u32 %s2829_s30, 8  ;;  %s2831_s5 = smov %s2830_s27 }
 0x5db   : > { %s2599_s16 = scalar_lea.hbm %s2830_s27, %s1168_s19  ;;  %p1732_p12 = pneg %p1731_p10 }
 0x5dc   : > { %p1736_p9 = scmp.lt.s32.totalorder %s2602_s14, %s1734_s15  ;;  %p1737_p6 = scmp.lt.s32.totalorder %s1735_s9, %s1729_s4 }
 0x5de   : > { %p1738_p8 = por %p1737_p6, %p1736_p9 }
 0x5e0   : > { %p1739_p11 = pnand %p1738_p8, %p1732_p12 }
 0x5e2   : > { %1742 = shalt.err (!%p1739_p11)
}
 0x5e3   : > { %s1743_s28 = scalar_lea.hbm %s2599_s16, 256  ;;  %s1747_s6 = scalar_lea.hbm %s2831_s5, 512 }
 0x5e4   : > { %p1744_p5 = scmp.ne.s32.totalorder %s2599_s16, %s1743_s28  ;;  %p1748_p13 = scmp.lt.u32.totalorder %s2599_s16, %s2831_s5 }
 0x5e5   : > { %p1749_p7 = scmp.lt.u32.totalorder %s1747_s6, %s1743_s28  ;;  %p1751_p2 = scmp.lt.u32.totalorder %s1743_s28, %s2599_s16 }
 0x5e6   : > { %p1745_p3 = pnand %p1744_p5, %p2832_p1 }
 0x5e7   : > { %p1750_p4 = por %p1749_p7, %p1748_p13 }
 0x5e8   : > { %p1746_p0 = pneg %p1745_p3 }
 0x5e9   : > { %p1752_p10 = por %p1751_p2, %p1750_p4 }
 0x5eb   : > { %p1753_p12 = pnand %p1752_p10, %p1746_p0 }
 0x5ed   : > { %1756 = shalt.err (!%p1753_p12)
}
 0x5ee   : > { %s1937_s20 = smov 128   ;;  %s1938_s12 = smov 8  }
 0x5ef   : > { %1331 = dma.vmem_to_hbm [thread:$0]  (%p2832_p1), %s2602_s14, 256, %s2599_s16, %s924_s0, %s1937_s20, %s1937_s20, %s1938_s12  }
 0x5f0 PF: > { %s2833_s8 = sld [smem:[#allocation39_spill]]  ;;  %s2834_s13 = sld [smem:[#allocation53_spill]] }
 0x5f1   : > { %p1368_p9 = scmp.ge.s32.totalorder %s1921_s17, 2 }
 0x5f6   : > { %s952_s30 = sand.u32 1, %s2833_s8   ;;  %p2835_p6 = scmp.ne.s32.totalorder %s2834_s13, 0 }
 0x5f7   : > { %s953_s19 = scalar_lea.sflag [#allocation8], %s952_s30 }
 0x5f8   : > { %p1360_p8 = pnand %p1368_p9, %p2835_p6 }
 0x5fa   : > { %1852 = dma.done.wait (!%p1360_p8), %s953_s19, 256  }
 0x5fb   : > { %1854 = vsyncadd (!%p1360_p8), %s953_s19, 4294967040  ;;  %s37_s17 = sadd.s32 1, %s1921_s17   ;;  %s2837_s0 = sld [smem:[#allocation33_spill]] }
 0x5fc   : > { %p2633_p11 = scmp.ge.s32.totalorder %s37_s17, 18   ;;  %s2838_s25 = sld [smem:[#allocation34_spill]] }
 0x5fd   : > { %s2839_s21 = sld [smem:[#allocation36_spill]]  ;;  %s2840_s28 = sld [smem:[#allocation54_spill]] }
 0x5fe   : > { %s2841_s29 = sld [smem:[#allocation37_spill]]  ;;  %s2842_s30 = sld [smem:[#allocation38_spill]] }
 0x5ff   : > { %s2843_s9 = sld [smem:[#allocation51_spill]]  ;;  %s2844_s24 = sld [smem:[#allocation40_spill]] }
 0x600   : > { %s2845_s12 = sld [smem:[#allocation52_spill]]  ;;  %s2846_s13 = sld [smem:[#allocation43_spill]] }
 0x601   : > { %s2847_s14 = sld [smem:[#allocation44_spill]]  ;;  %s2848_s15 = sld [smem:[#allocation46_spill]] }
 0x602   : > { %s2849_s16 = sld [smem:[#allocation47_spill]]  ;;  %s2851_s26 = smov %s2871_s2 }
 0x603   : > { %s2852_s27 = smov %s1873_s1  ;;  %s2853_s1 = smov %s2839_s21 }
 0x604   : > { %s2854_s10 = smov %s1897_s11  ;;  %36 = sbr.rel (!%p2633_p11) target bundleno = 38 (0x26), region = 146 }
 0x605   : > { %s2855_s11 = smov %s2844_s24 }
 0x60b   :  { %958 = vsyncpa [#allocation7], 1 }
 0x60c   :  { %960 = vsyncpa [#allocation7 + $0x1], 1 }
 0x60d   :  { %961 = vsyncpa [#allocation10], 1 }
 0x60e   :  { %963 = vsyncpa [#allocation10 + $0x1], 1 }
 0x60f   :  { %964 = vsyncpa [#allocation13], 1 }
 0x610   :  { %966 = vsyncpa [#allocation13 + $0x1], 1 }
 0x611   :  { %967 = vsyncpa [#allocation16], 1 }
 0x612   :  { %968 = vsyncpa [#allocation8], 1 }
 0x613   :  { %970 = vsyncpa [#allocation8 + $0x1], 1 }

</bundles_post_ra>
